<compile_context>
chip_gen: v7x
topology: tpu7x:2x2x1
jax: 0.10.0
libtpu: 0.0.40
codegen_flags: <defaults>
</compile_context>

<pallas_src>
import math

import jax
import jax.numpy as jnp
from jax import lax
from jax.experimental import pallas as pl
from jax.experimental.pallas import tpu as pltpu


_NEG_BIG = -0.7 * float(jnp.finfo(jnp.float32).max)  # safe "-inf" for masking


def _round_up(x, m):
    return ((x + m - 1) // m) * m


def _cdiv(a, b):
    return (a + b - 1) // b


def _make_attn_kernel(ch, length, t_pad):
    # Fold both per-operand scales (1/ch**0.25 on q and on k) into one f32
    # multiply on the scores: (q*s) @ (k*s) == (q @ k) * s^2.
    scale2 = 1.0 / math.sqrt(ch)
    mask_keys = t_pad != length  # padded key columns must not enter the softmax

    def kernel(q_ref, k_ref, v_ref, o_ref):
        q = q_ref[...]                      # (hb, Tp, Cp)  channels-last
        k = k_ref[...]                      # (hb, Cp, Tp)
        v = v_ref[...]                      # (hb, Cp, Tp)

        # scores[h, t, s] = sum_c q[h, t, c] * k[h, c, s]
        # LHS contracts its lane axis, RHS its sublane axis -> native MXU form,
        # no in-kernel transpose.  f32 accumulation.
        s = lax.dot_general(
            q, k,
            dimension_numbers=(((2,), (1,)), ((0,), (0,))),
            preferred_element_type=jnp.float32,
        )
        s = s * scale2

        if mask_keys:
            # Small additive row mask, broadcast over heads / query rows.
            key_idx = lax.broadcasted_iota(jnp.int32, (1, t_pad), 1)
            key_mask = jnp.where(key_idx < length, 0.0, _NEG_BIG).astype(jnp.float32)
            s = s + key_mask                # (1,Tp) -> (hb,Tq,Tp)

        # f32 softmax over keys; normalization deferred past the PV matmul.
        m = jnp.max(s, axis=-1, keepdims=True)
        p = jnp.exp(s - m)                  # (hb, Tq, Tp) f32, unnormalized
        l = jnp.sum(p, axis=-1)             # (hb, Tq)

        # a_unnorm[h, c, t] = sum_s v[h, c, s] * p[h, t, s]
        # (weights cast back to input dtype, as the torch reference does)
        a = lax.dot_general(
            v, p.astype(v.dtype),
            dimension_numbers=(((2,), (2,)), ((0,), (0,))),
            preferred_element_type=jnp.float32,
        )                                   # (hb, Cp, Tq) f32

        # Exact reciprocal: only O(hb*T) EUP work (noise-level cost) and it
        # keeps the strict f32 self-check tight.
        inv_l = pl.reciprocal(l, approx=False)
        o_ref[...] = (a * inv_l[:, None, :]).astype(o_ref.dtype)

    return kernel


def _vmem_capacity_bytes():
    try:
        return int(pltpu.get_tpu_info().vmem_capacity_bytes)
    except Exception:
        return 64 * 1024 * 1024   # conservative (v7x-sized) fallback


def _choose_schedule(B, per_head_bytes, budget_bytes, prefer_even_steps):
    """Pick heads-per-block hb and grid step count (head axis padded to hb*steps)."""
    hb = max(1, min(B, budget_bytes // max(per_head_bytes, 1)))
    steps = _cdiv(B, hb)
    if prefer_even_steps and B > 1 and steps % 2:
        # v7x: 2 TensorCores share the "parallel" axis; odd step counts leave
        # one TC idle for part of the kernel.
        steps += 1
        hb = _cdiv(B, steps)
    return hb, steps


def qkv_attention(qkv, n_heads):
    """Pallas implementation of QKVAttention.forward.

    qkv: [N, 3*H*C, T]  ->  returns [N, H*C, T]
    """
    bs, width, length = qkv.shape
    assert width % (3 * n_heads) == 0
    ch = width // (3 * n_heads)
    B = bs * n_heads

    q, k, v = jnp.split(qkv, 3, axis=1)
    # q goes channels-last so the QK contraction sits on its lane axis (no
    # in-kernel transpose); k/v stay channels-first (their contractions are
    # already in the MXU-friendly transposed-weight-push form).
    q = q.reshape(B, ch, length).transpose(0, 2, 1)   # (B, T, C)
    k = k.reshape(B, ch, length)                      # (B, C, T)
    v = v.reshape(B, ch, length)                      # (B, C, T)

    itemsize = jnp.dtype(qkv.dtype).itemsize
    c_mult = max(8, 32 // itemsize)          # sublane multiple: 8 f32, 16 bf16
    t_pad = _round_up(length, 128)           # lane multiple -> dense vst
    c_pad = _round_up(ch, c_mult)

    if (t_pad, c_pad) != (length, ch):
        q = jnp.pad(q, ((0, 0), (0, t_pad - length), (0, c_pad - ch)))
        kv_pad = ((0, 0), (0, c_pad - ch), (0, t_pad - length))
        k = jnp.pad(k, kv_pad)
        v = jnp.pad(v, kv_pad)

    # ---- generation-aware block sizing -------------------------------------
    vmem_cap = _vmem_capacity_bytes()
    small_vmem = vmem_cap <= 64 * 1024 * 1024          # v7x-style part (2 TCs)
    budget = 30 * 1024 * 1024 if small_vmem else 88 * 1024 * 1024
    base_limit = 48 * 1024 * 1024 if small_vmem else 100 * 1024 * 1024

    c_lane = _round_up(c_pad, 128)           # q's lane dim pads to 128 in VMEM
    per_head = (
        2 * t_pad * c_lane * itemsize        # q block (double buffered)
        + 2 * 3 * c_pad * t_pad * itemsize   # k, v, out blocks (double buffered)
        + 2 * t_pad * t_pad * 4              # s / p f32 intermediates
        + c_pad * t_pad * 4                  # f32 accumulator before output cast
    )
    # TODO(synk): when per_head alone exceeds the budget (T >~ 1.5-2k) switch to
    # flash-style key chunking instead of just raising the VMEM limit.
    hb, steps = _choose_schedule(B, per_head, budget, prefer_even_steps=small_vmem)

    B_pad = hb * steps
    if B_pad != B:
        bpad = ((0, B_pad - B), (0, 0), (0, 0))
        q = jnp.pad(q, bpad)
        k = jnp.pad(k, bpad)
        v = jnp.pad(v, bpad)

    vmem_limit = int(min(0.9 * vmem_cap, max(base_limit, hb * per_head + (4 << 20))))

    q_spec = pl.BlockSpec((hb, t_pad, c_pad), lambda b: (b, 0, 0))
    kv_spec = pl.BlockSpec((hb, c_pad, t_pad), lambda b: (b, 0, 0))

    out = pl.pallas_call(
        _make_attn_kernel(ch, length, t_pad),
        out_shape=jax.ShapeDtypeStruct((B_pad, c_pad, t_pad), qkv.dtype),
        grid_spec=pltpu.PrefetchScalarGridSpec(
            num_scalar_prefetch=0,
            grid=(steps,),
            in_specs=[q_spec, kv_spec, kv_spec],
            out_specs=kv_spec,
        ),
        compiler_params=pltpu.CompilerParams(
            dimension_semantics=("parallel",),
            vmem_limit_bytes=vmem_limit,
        ),
    )(q, k, v)

    out = out[:B, :ch, :length]
    return out.reshape(bs, n_heads * ch, length)


def qkv_attention_ref(qkv, n_heads):
    """Pure-JAX reference mirroring the PyTorch forward exactly."""
    bs, width, length = qkv.shape
    ch = width // (3 * n_heads)
    q, k, v = jnp.split(qkv, 3, axis=1)
    scale = 1.0 / math.sqrt(math.sqrt(ch))
    qh = (q * scale).reshape(bs * n_heads, ch, length)
    kh = (k * scale).reshape(bs * n_heads, ch, length)
    vh = v.reshape(bs * n_heads, ch, length)
    weight = jnp.einsum('bct,bcs->bts', qh, kh)
    weight = jax.nn.softmax(weight.astype(jnp.float32), axis=-1).astype(weight.dtype)
    a = jnp.einsum('bts,bcs->bct', weight, vh)
    return a.reshape(bs, -1, length)


if __name__ == "__main__":
    # Small deterministic example: N=2, heads=2, ch=8, T=16  ->  qkv [2, 48, 16]
    n_heads = 2
    N, C, T = 2, 8, 16
    key = jax.random.PRNGKey(0)
    qkv = jax.random.normal(key, (N, 3 * n_heads * C, T), dtype=jnp.float32)

    out = qkv_attention(qkv, n_heads)
    out = jax.block_until_ready(out)

    ref = qkv_attention_ref(qkv, n_heads)
    assert out.shape == (N, n_heads * C, T)
    # Deferred softmax normalization changes accumulation order slightly vs the
    # normalize-then-matmul reference; tolerance widened accordingly.
    assert jnp.allclose(out, ref, atol=1e-3, rtol=1e-3), "mismatch vs reference"

    print("KERNEL_OK")
</pallas_src>

<mosaic_0001>
module attributes {stable_mosaic.version = 11 : i64} {
  func.func @kernel(%arg0: i32, %arg1: memref<2x128x8xf32, #tpu.memory_space<vmem>>, %arg2: memref<2x8x128xf32, #tpu.memory_space<vmem>>, %arg3: memref<2x8x128xf32, #tpu.memory_space<vmem>>, %arg4: memref<2x8x128xf32, #tpu.memory_space<vmem>>) attributes {dimension_semantics = [#tpu.dimension_semantics<parallel>], iteration_bounds = array<i64: 2>, scalar_prefetch = 0 : i64, scratch_operands = 0 : i64, tpu.core_type = #tpu.core_type<tc>, window_params = [{transform_indices = @transform_0, window_bounds = array<i64: 2, 128, 8>}, {transform_indices = @transform_1, window_bounds = array<i64: 2, 8, 128>}, {transform_indices = @transform_2, window_bounds = array<i64: 2, 8, 128>}, {transform_indices = @transform_3, window_bounds = array<i64: 2, 8, 128>}]} {
    %c0 = arith.constant 0 : index
    %c0_0 = arith.constant 0 : index
    %c0_1 = arith.constant 0 : index
    %0 = vector.load %arg1[%c0, %c0_0, %c0_1] : memref<2x128x8xf32, #tpu.memory_space<vmem>>, vector<2x128x8xf32>
    %c0_2 = arith.constant 0 : index
    %c0_3 = arith.constant 0 : index
    %c0_4 = arith.constant 0 : index
    %1 = vector.load %arg2[%c0_2, %c0_3, %c0_4] : memref<2x8x128xf32, #tpu.memory_space<vmem>>, vector<2x8x128xf32>
    %c0_5 = arith.constant 0 : index
    %c0_6 = arith.constant 0 : index
    %c0_7 = arith.constant 0 : index
    %2 = vector.load %arg3[%c0_5, %c0_6, %c0_7] : memref<2x8x128xf32, #tpu.memory_space<vmem>>, vector<2x8x128xf32>
    %cst = arith.constant dense<0.000000e+00> : vector<2x128x128xf32>
    %3 = tpu.matmul %0, %1, %cst {dimension_numbers = #tpu.dot_dimension_numbers<[2], [1], [1], [2], [0, 0, 0, 1, 1, 2], [0], [0]>} : vector<2x128x8xf32>, vector<2x8x128xf32>, vector<2x128x128xf32> -> vector<2x128x128xf32>
    %cst_8 = arith.constant 0.353553385 : f32
    %4 = vector.broadcast %cst_8 : f32 to vector<2x128x128xf32>
    %5 = arith.mulf %3, %4 : vector<2x128x128xf32>
    %6 = tpu.iota {dimensions = array<i32: 1>} : vector<1x128xi32>
    %c16_i32 = arith.constant 16 : i32
    %7 = vector.broadcast %c16_i32 : i32 to vector<1x128xi32>
    %8 = arith.cmpi slt, %6, %7 : vector<1x128xi32>
    %cst_9 = arith.constant 0.000000e+00 : f32
    %cst_10 = arith.constant -2.38197633E+38 : f32
    %9 = vector.broadcast %cst_9 : f32 to vector<1x128xf32>
    %10 = vector.broadcast %cst_10 : f32 to vector<1x128xf32>
    %11 = arith.select %8, %9, %10 : vector<1x128xi1>, vector<1x128xf32>
    %12 = vector.shape_cast %11 : vector<1x128xf32> to vector<1x1x128xf32>
    %13 = vector.broadcast %12 : vector<1x1x128xf32> to vector<2x128x128xf32>
    %14 = arith.addf %5, %13 : vector<2x128x128xf32>
    %cst_11 = arith.constant dense<0xFF800000> : vector<2x128xf32>
    %15 = vector.multi_reduction <maximumf>, %14, %cst_11 [2] : vector<2x128x128xf32> to vector<2x128xf32>
    %16 = vector.shape_cast %15 : vector<2x128xf32> to vector<2x128x1xf32>
    %17 = vector.broadcast %16 : vector<2x128x1xf32> to vector<2x128x128xf32>
    %18 = arith.subf %14, %17 : vector<2x128x128xf32>
    %19 = math.exp %18 : vector<2x128x128xf32>
    %cst_12 = arith.constant dense<0.000000e+00> : vector<2x128xf32>
    %20 = vector.multi_reduction <add>, %19, %cst_12 [2] : vector<2x128x128xf32> to vector<2x128xf32>
    %cst_13 = arith.constant dense<0.000000e+00> : vector<2x8x128xf32>
    %21 = tpu.matmul %2, %19, %cst_13 {dimension_numbers = #tpu.dot_dimension_numbers<[2], [2], [1], [1], [0, 0, 0, 1, 1, 1], [0], [0]>} : vector<2x8x128xf32>, vector<2x128x128xf32>, vector<2x8x128xf32> -> vector<2x8x128xf32>
    %22 = tpu.reciprocal %20 : vector<2x128xf32> -> vector<2x128xf32>
    %23 = vector.shape_cast %22 : vector<2x128xf32> to vector<2x1x128xf32>
    %24 = vector.broadcast %23 : vector<2x1x128xf32> to vector<2x8x128xf32>
    %25 = arith.mulf %21, %24 : vector<2x8x128xf32>
    %c0_14 = arith.constant 0 : index
    %c0_15 = arith.constant 0 : index
    %c0_16 = arith.constant 0 : index
    %26 = vector.load %arg4[%c0_14, %c0_15, %c0_16] : memref<2x8x128xf32, #tpu.memory_space<vmem>>, vector<2x8x128xf32>
    tpu.vector_store %arg4[%c0_14, %c0_15, %c0_16], %25 {strides = array<i32>} : memref<2x8x128xf32, #tpu.memory_space<vmem>>, vector<2x8x128xf32>,
    return
  }
  func.func @transform_0(%arg0: i32) -> (i32, i32, i32) {
    %c0_i32 = arith.constant 0 : i32
    %c0_i32_0 = arith.constant 0 : i32
    %c0_i32_1 = arith.constant 0 : i32
    return %arg0, %c0_i32, %c0_i32_0 : i32, i32, i32
  }
  func.func @transform_1(%arg0: i32) -> (i32, i32, i32) {
    %c0_i32 = arith.constant 0 : i32
    %c0_i32_0 = arith.constant 0 : i32
    %c0_i32_1 = arith.constant 0 : i32
    return %arg0, %c0_i32, %c0_i32_0 : i32, i32, i32
  }
  func.func @transform_2(%arg0: i32) -> (i32, i32, i32) {
    %c0_i32 = arith.constant 0 : i32
    %c0_i32_0 = arith.constant 0 : i32
    %c0_i32_1 = arith.constant 0 : i32
    return %arg0, %c0_i32, %c0_i32_0 : i32, i32, i32
  }
  func.func @transform_3(%arg0: i32) -> (i32, i32, i32) {
    %c0_i32 = arith.constant 0 : i32
    %c0_i32_0 = arith.constant 0 : i32
    %c0_i32_1 = arith.constant 0 : i32
    return %arg0, %c0_i32, %c0_i32_0 : i32, i32, i32
  }
}

</mosaic_0001>

<bundles_post_ra>
// kernel: tpu_custom_call.1
= control target key start
LH: loop header
LB: loop body
LE: loop exit
PB: predicated region body
PF: predicated region fallthrough
CT: control target
= control target key end

     0   :  { %8 = vsyncpa [#allocation3], 0  ;;  %s2457_s0 = inlined_call_operand.vmem [shape: f32[4,128,8], index: 0, kind: input, shape index: {}]   ;;  %s2458_s1 = inlined_call_operand.vmem [shape: f32[4,8,128], index: 1, kind: input, shape index: {}]   ;;  %s2459_s2 = inlined_call_operand.vmem [shape: f32[4,8,128], index: 2, kind: input, shape index: {}]   ;;  %s2460_s3 = inlined_call_operand.hbm [shape: f32[4,8,128], index: 3, kind: output, shape index: {}]  }
   0x1   :  { %10 = vsyncpa [#allocation3 + $0x1], 0  ;;  %s2003_s12 = smov 0   ;;  %s2005_s13 = smov 0  }
   0x2   :  { %s2007_s14 = smov 0   ;;  %s2009_s15 = smov 0  }
   0x3 LB: > { %s2024_s16 = sadd.s32 4294967295, %s1974_s15   ;;  %s1450_s17 = sadd.s32 4294967294, %s1974_s15   ;;  %s1974_s15 = sphi %s2009_s15, %s2466_s15   ;;  %s1970_s14 = sphi %s2007_s14, %s2465_s14   ;;  %s1966_s13 = sphi %s2005_s13, %s2464_s13   ;;  %s1962_s12 = sphi %s2003_s12, %s2463_s12  }
   0x4   : > { %s2028_s18 = sadd.s32 1, %s1974_s15   ;;  %s101_s19 = sadd.s32 1, %s1970_s14 }
   0x5   : > { %s98_s20 = ssub.s32 %s1974_s15, %s2028_s18  ;;  %p111_p0 = scmp.ne.s32.totalorder %s1970_s14, %s1966_s13 }
   0x6   : > { %p99_p1 = scmp.eq.s32.totalorder %s98_s20, 0  ;;  %p112_p2 = scmp.eq.s32.totalorder %s2024_s16, 1 }
   0x7   : > { %p117_p3 = scmp.ne.s32.totalorder %s1966_s13, %s1962_s12  ;;  %p118_p4 = scmp.eq.s32.totalorder %s1450_s17, 1 }
   0x8   : > { %s2039_s21 = scalar_select %p99_p1, %s1970_s14, %s101_s19  }
   0x9   : > { %p2041_p5 = por %p112_p2, %p111_p0  ;;  %p2045_p6 = por %p118_p4, %p117_p3 }
   0xa   : > { %p1453_p7 = scmp.ge.s32.totalorder %s1974_s15, 1  ;;  %p164_p8 = scmp.lt.s32.totalorder %s1974_s15, 3 }
   0xc   : > { %p165_p9 = pnand %p1453_p7, %p164_p8 }
   0xd   : > { %s1455_s24 = sshll.u32 (!%p165_p9), %s2024_s16, 1  ;;  %vm255_vm0 = vcmask (!%p165_p9), 64512   ;;  %v674_v34 = vlaneseq (!%p165_p9)  ;;  %v1976_v38 = vmov (!%p165_p9), -2.3819763e+38   ;;  %vm1978_vm2 = vmmov (!%p165_p9), 0   ;;  %s196_s9 = sand.u32 (!%p165_p9), 1, %s1966_s13  }
   0xe   : > { %168 = sbr.rel (%p165_p9) target bundleno = 700 (0x2bc), region = 32  ;;  %p200_p10 = scmp.lt.s32.totalorder (!%p165_p9), %s1455_s24, 3  ;;  %vm1147_vm3 = vcmask (!%p165_p9), 130112   ;;  %vm1154_vm4 = vcmask (!%p165_p9), 195712   ;;  %vm1161_vm5 = vcmask (!%p165_p9), 261312   ;;  %vm1168_vm6 = vcmask (!%p165_p9), 326912  }
   0xf   : > { %v2131_v35 = vand.u32 (!%p165_p9), 127, %v674_v34  ;;  %vm1175_vm7 = vcmask (!%p165_p9), 392512   ;;  %vm1182_vm8 = vcmask (!%p165_p9), 458112   ;;  %vm1189_vm9 = vcmask (!%p165_p9), 523712   ;;  %s1454_s10 = sshll.u32 (!%p165_p9), %s196_s9, 4  ;;  %s1500_s19 = sshll.u32 (!%p165_p9), %s2024_s16, 8 }
  0x10   : > { %vm1196_vm10 = vcmask (!%p165_p9), 589312   ;;  %vm1203_vm11 = vcmask (!%p165_p9), 654912   ;;  %vm1210_vm12 = vcmask (!%p165_p9), 720512   ;;  %vm1217_vm13 = vcmask (!%p165_p9), 786112   ;;  %s198_s11 = scalar_lea.vmem (!%p165_p9), [#allocation2], %s1454_s10  ;;  %s1980_s27 = smov (!%p165_p9), [#allocation2]  }
  0x11   : > { %vm676_vm1 = vcmp.lt.s32.totalorder (!%p165_p9), %v2131_v35, 16  ;;  %vm1224_vm14 = vcmask (!%p165_p9), 851712   ;;  %vm1231_vm15 = vcmask (!%p165_p9), 917312   ;;  %s1364_s17 = sshll.u32 (!%p165_p9), %s198_s11, 4  ;;  %s1916_s28 = sshll.u32 (!%p165_p9), %s1980_s27, 4  ;;  %s2407_s17 = int_to_ptr.vmem [resolvable:$true] %s1364_s17  ;;  %s1917_s28 = int_to_ptr.vmem [resolvable:$false] %s1916_s28 }
  0x12   : > { %v2134_v39 = vsel (!%p165_p9), %vm676_vm1, 0.0, %v1976_v38  ;;  %vm1245_vm1 = vcmask (!%p165_p9), 1048512   ;;  %p1919_p0 = scmp.lt.s32.totalorder (!%p165_p9), %s2407_s17, %s1917_s28 }
  0x15   : > { %s2468_s24 = smov (!%p200_p10, %s1455_s24), 3 }
  0x16   : > { %s1499_s25 = sshll.u32 %s2468_s24, 7  ;;  %s1459_s26 = sshll.u32 %s2468_s24, 3 }
  0x17   : > { %s2059_s29 = scalar_lea.vmem %s2457_s0, %s1499_s25  ;;  %s210_s5 = scalar_lea.vmem %s2458_s1, %s1459_s26 }
  0x18   : > { %v251_v0 = vld [vmem:[%s210_s5] sm:$0xff]  ;;  %v252_v1 = vld [vmem:[%s210_s5 + $0x8] sm:$0xff]  ;;  %v221_v6 = vld [vmem:[%s2059_s29 + $0x10] sm:$0xff]  ;;  %s216_s8 = scalar_lea.vmem %s2459_s2, %s1459_s26  ;;  %s2412_s24 = scalar_lea.hbm %s2460_s3, %s1500_s19 }
  0x19   : > { %v219_v2 = vld [vmem:[%s2059_s29] sm:$0xff]  ;;  %1569 = vmatprep.subr.mxu0 %v251_v0  ;;  %1595 = vmatprep.subr.mxu1 %v252_v1  ;;  %v220_v4 = vld [vmem:[%s2059_s29 + $0x8] sm:$0xff]  ;;  %v237_v7 = vld [vmem:[%s2059_s29 + $0x90] sm:$0xff]  ;;  %s2416_s25 = scalar_lea.sflag [#allocation3], %s196_s9  ;;  %s1912_s26 = scalar_lea.vmem %s2407_s17, 256 }
  0x1a   : > { %v235_v3 = vld [vmem:[%s2059_s29 + $0x80] sm:$0xff]  ;;  %1570 = vmatpush3.msra.mxu0 %v251_v0  ;;  %1571 = vmatprep.mubr.msk.f32.mxu0 %vm255_vm0, %v219_v2  ;;  %v236_v5 = vld [vmem:[%s2059_s29 + $0x88] sm:$0xff]  ;;  %v222_v8 = vld [vmem:[%s2059_s29 + $0x18] sm:$0xff]  ;;  %p1913_p11 = scmp.ne.s32.totalorder %s2407_s17, %s1912_s26 }
  0x1b   : > { %1596 = vmatpush3.msra.mxu1 %v252_v1  ;;  %1597 = vmatprep.mubr.msk.f32.mxu1 %vm255_vm0, %v235_v3  ;;  %v238_v9 = vld [vmem:[%s2059_s29 + $0x98] sm:$0xff]  ;;  %v223_v10 = vld [vmem:[%s2059_s29 + $0x20] sm:$0xff]  ;;  %v224_v12 = vld [vmem:[%s2059_s29 + $0x28] sm:$0xff] }
  0x1c   : > { %1572 = vmatmul.mubr.msk.f32.vlgmr.msra.gmra.mrb[0].mxu0 %vm255_vm0, %v220_v4  ;;  %1598 = vmatmul.mubr.msk.f32.vlgmr.msra.gmra.mrb[0].mxu1 %vm255_vm0, %v236_v5  ;;  %v239_v11 = vld [vmem:[%s2059_s29 + $0xa0] sm:$0xff]  ;;  %v240_v13 = vld [vmem:[%s2059_s29 + $0xa8] sm:$0xff]  ;;  %v225_v14 = vld [vmem:[%s2059_s29 + $0x30] sm:$0xff]  ;;  %p1914_p12 = pnand %p1913_p11, %p2041_p5 }
  0x1d   : > { %1574 = vmatprep.mubr.msk.f32.mxu0 %vm255_vm0, %v221_v6  ;;  %1600 = vmatprep.mubr.msk.f32.mxu1 %vm255_vm0, %v237_v7  ;;  %v241_v15 = vld [vmem:[%s2059_s29 + $0xb0] sm:$0xff]  ;;  %v226_v16 = vld [vmem:[%s2059_s29 + $0x38] sm:$0xff]  ;;  %v227_v18 = vld [vmem:[%s2059_s29 + $0x40] sm:$0xff] }
  0x1e   : > { %v242_v17 = vld [vmem:[%s2059_s29 + $0xb8] sm:$0xff]  ;;  %v243_v19 = vld [vmem:[%s2059_s29 + $0xc0] sm:$0xff]  ;;  %v228_v20 = vld [vmem:[%s2059_s29 + $0x48] sm:$0xff]  ;;  %p1915_p13 = pneg %p1914_p12 }
  0x1f   : > { %v244_v21 = vld [vmem:[%s2059_s29 + $0xc8] sm:$0xff]  ;;  %v229_v22 = vld [vmem:[%s2059_s29 + $0x50] sm:$0xff]  ;;  %v230_v24 = vld [vmem:[%s2059_s29 + $0x58] sm:$0xff] }
  0x20   : > { %1575 = vmatmul.mubr.msk.f32.gmra.mrb[2].mxu0 %vm255_vm0, %v222_v8  ;;  %1601 = vmatmul.mubr.msk.f32.gmra.mrb[2].mxu1 %vm255_vm0, %v238_v9  ;;  %v245_v23 = vld [vmem:[%s2059_s29 + $0xd0] sm:$0xff]  ;;  %v246_v25 = vld [vmem:[%s2059_s29 + $0xd8] sm:$0xff]  ;;  %v231_v26 = vld [vmem:[%s2059_s29 + $0x60] sm:$0xff] }
  0x21   : > { %1577 = vmatprep.mubr.msk.f32.mxu0 %vm255_vm0, %v223_v10  ;;  %1603 = vmatprep.mubr.msk.f32.mxu1 %vm255_vm0, %v239_v11  ;;  %v247_v27 = vld [vmem:[%s2059_s29 + $0xe0] sm:$0xff]  ;;  %v232_v28 = vld [vmem:[%s2059_s29 + $0x68] sm:$0xff]  ;;  %v233_v30 = vld [vmem:[%s2059_s29 + $0x70] sm:$0xff] }
  0x22   : > { %v248_v29 = vld [vmem:[%s2059_s29 + $0xe8] sm:$0xff]  ;;  %v249_v31 = vld [vmem:[%s2059_s29 + $0xf0] sm:$0xff]  ;;  %v234_v32 = vld [vmem:[%s2059_s29 + $0x78] sm:$0xff] }
  0x23   : > { %v250_v33 = vld [vmem:[%s2059_s29 + $0xf8] sm:$0xff]  ;;  %s1918_s29 = scalar_lea.vmem %s1917_s28, 512 }
  0x24   : > { %1578 = vmatmul.mubr.msk.f32.gmra.mrb[4].mxu0 %vm255_vm0, %v224_v12  ;;  %1604 = vmatmul.mubr.msk.f32.gmra.mrb[4].mxu1 %vm255_vm0, %v240_v13  ;;  %p1920_p1 = scmp.lt.s32.totalorder %s1918_s29, %s1912_s26 }
  0x25   : > { %1580 = vmatprep.mubr.msk.f32.mxu0 %vm255_vm0, %v225_v14  ;;  %1606 = vmatprep.mubr.msk.f32.mxu1 %vm255_vm0, %v241_v15 }
  0x26   : > { %p1921_p2 = por %p1920_p1, %p1919_p0 }
  0x28   : > { %1581 = vmatmul.mubr.msk.f32.gmra.mrb[6].mxu0 %vm255_vm0, %v226_v16  ;;  %1607 = vmatmul.mubr.msk.f32.gmra.mrb[6].mxu1 %vm255_vm0, %v242_v17  ;;  %p1922_p3 = pnand %p1921_p2, %p1915_p13 }
  0x29   : > { %1583 = vmatprep.mubr.msk.f32.mxu0 %vm255_vm0, %v227_v18  ;;  %1609 = vmatprep.mubr.msk.f32.mxu1 %vm255_vm0, %v243_v19 }
  0x2c   : > { %1584 = vmatmul.mubr.msk.f32.gmra.mrb[8].mxu0 %vm255_vm0, %v228_v20  ;;  %1610 = vmatmul.mubr.msk.f32.gmra.mrb[8].mxu1 %vm255_vm0, %v244_v21 }
  0x2d   : > { %1586 = vmatprep.mubr.msk.f32.mxu0 %vm255_vm0, %v229_v22  ;;  %1612 = vmatprep.mubr.msk.f32.mxu1 %vm255_vm0, %v245_v23 }
  0x30   : > { %1587 = vmatmul.mubr.msk.f32.gmra.mrb[10].mxu0 %vm255_vm0, %v230_v24  ;;  %1613 = vmatmul.mubr.msk.f32.gmra.mrb[10].mxu1 %vm255_vm0, %v246_v25 }
  0x31   : > { %1589 = vmatprep.mubr.msk.f32.mxu0 %vm255_vm0, %v231_v26  ;;  %1615 = vmatprep.mubr.msk.f32.mxu1 %vm255_vm0, %v247_v27 }
  0x34   : > { %1590 = vmatmul.mubr.msk.f32.gmra.mrb[12].mxu0 %vm255_vm0, %v232_v28  ;;  %1616 = vmatmul.mubr.msk.f32.gmra.mrb[12].mxu1 %vm255_vm0, %v248_v29 }
  0x35   : > { %1592 = vmatprep.mubr.msk.f32.mxu0 %vm255_vm0, %v233_v30  ;;  %1618 = vmatprep.mubr.msk.f32.mxu1 %vm255_vm0, %v249_v31 }
  0x38   : > { %1593 = vmatmul.mubr.msk.f32.gmra.mrb[14].mxu0 %vm255_vm0, %v234_v32  ;;  %1619 = vmatmul.mubr.msk.f32.gmra.mrb[14].mxu1 %vm255_vm0, %v250_v33  ;;  %vm1238_vm0 = vcmask 982912  }
  0xef   : > { %v1573_v36 = vpop.f32.mrb[0].mxu0  ;;  %v1599_v37 = vpop.f32.mrb[0].mxu1 }
  0xf0   : > { %v643_v40 = vmul.f32 0.35355338, %v1573_v36  ;;  %v659_v41 = vmul.f32 0.35355338, %v1599_v37  ;;  %v370_v42 = vpop.f32.mrb[1].mxu0  ;;  %v563_v43 = vpop.f32.mrb[1].mxu1 }
  0xf1   : > { %v642_v44 = vmul.f32 0.35355338, %v370_v42  ;;  %v658_v45 = vmul.f32 0.35355338, %v563_v43 }
  0xf2   : > { %v2137_v46 = vadd.f32 %v2134_v39, %v659_v41  ;;  %v2140_v47 = vadd.f32 %v2134_v39, %v643_v40 }
  0xf3   : > { %v1576_v48 = vpop.f32.mrb[2].mxu0  ;;  %v1602_v49 = vpop.f32.mrb[2].mxu1  ;;  %v2145_v54 = vadd.f32 %v2134_v39, %v658_v45  ;;  %v2148_v55 = vadd.f32 %v2134_v39, %v642_v44 }
  0xf4   : > { %744 = vmax.xlane.f32.xlu1 %v2137_v46  ;;  %712 = vmax.xlane.f32.xlu0 %v2140_v47  ;;  %v645_v50 = vmul.f32 0.35355338, %v1576_v48  ;;  %v380_v51 = vpop.f32.mrb[3].mxu0  ;;  %v573_v52 = vpop.f32.mrb[3].mxu1  ;;  %v661_v58 = vmul.f32 0.35355338, %v1602_v49 }
  0xf5   : > { %v644_v53 = vmul.f32 0.35355338, %v380_v51  ;;  %v660_v59 = vmul.f32 0.35355338, %v573_v52 }
  0xf6   : > { %v2153_v60 = vadd.f32 %v2134_v39, %v645_v50  ;;  %v2161_v4 = vadd.f32 %v2134_v39, %v661_v58 }
  0xf7   : > { %v1579_v56 = vpop.f32.mrb[4].mxu0  ;;  %v1605_v57 = vpop.f32.mrb[4].mxu1  ;;  %v2156_v61 = vadd.f32 %v2134_v39, %v644_v53  ;;  %v2164_v5 = vadd.f32 %v2134_v39, %v660_v59  ;;  %v1977_v53 = vmov 0.0|0.0  }
  0xf8   : > { %742 = vmax.xlane.f32.xlu1 %v2145_v54  ;;  %710 = vmax.xlane.f32.xlu0 %v2148_v55  ;;  %v390_v62 = vpop.f32.mrb[5].mxu0  ;;  %v583_v63 = vpop.f32.mrb[5].mxu1  ;;  %v647_v2 = vmul.f32 0.35355338, %v1579_v56  ;;  %v663_v10 = vmul.f32 0.35355338, %v1605_v57 }
  0xf9   : > { %v646_v3 = vmul.f32 0.35355338, %v390_v62  ;;  %v662_v11 = vmul.f32 0.35355338, %v583_v63  ;;  %1691 = vmatprep.subr.bf16.mxu0 %v1977_v53  ;;  %1715 = vmatprep.subr.bf16.mxu1 %v1977_v53 }
  0xfa   : > { %v2169_v12 = vadd.f32 %v2134_v39, %v647_v2  ;;  %v2177_v20 = vadd.f32 %v2134_v39, %v663_v10 }
  0xfb   : > { %v1582_v0 = vpop.f32.mrb[6].mxu0  ;;  %v1608_v1 = vpop.f32.mrb[6].mxu1  ;;  %v2172_v13 = vadd.f32 %v2134_v39, %v646_v3  ;;  %v2180_v21 = vadd.f32 %v2134_v39, %v662_v11 }
  0xfc   : > { %716 = vmax.xlane.f32.xlu1 %v2153_v60  ;;  %714 = vmax.xlane.f32.xlu0 %v2156_v61  ;;  %v400_v6 = vpop.f32.mrb[7].mxu0  ;;  %v593_v7 = vpop.f32.mrb[7].mxu1  ;;  %v649_v18 = vmul.f32 0.35355338, %v1582_v0  ;;  %v665_v26 = vmul.f32 0.35355338, %v1608_v1 }
  0xfd   : > { %v648_v19 = vmul.f32 0.35355338, %v400_v6  ;;  %v664_v27 = vmul.f32 0.35355338, %v593_v7 }
  0xfe   : > { %v2185_v28 = vadd.f32 %v2134_v39, %v649_v18  ;;  %v2193_v38 = vadd.f32 %v2134_v39, %v665_v26 }
  0xff   : > { %v1585_v8 = vpop.f32.mrb[8].mxu0  ;;  %v1611_v9 = vpop.f32.mrb[8].mxu1  ;;  %v2188_v29 = vadd.f32 %v2134_v39, %v648_v19  ;;  %v2196_v40 = vadd.f32 %v2134_v39, %v664_v27 }
 0x100   : > { %748 = vmax.xlane.f32.xlu1 %v2161_v4  ;;  %746 = vmax.xlane.f32.xlu0 %v2164_v5  ;;  %v410_v14 = vpop.f32.mrb[9].mxu0  ;;  %v603_v15 = vpop.f32.mrb[9].mxu1  ;;  %v651_v36 = vmul.f32 0.35355338, %v1585_v8  ;;  %v667_v43 = vmul.f32 0.35355338, %v1611_v9 }
 0x101   : > { %v650_v37 = vmul.f32 0.35355338, %v410_v14  ;;  %v666_v44 = vmul.f32 0.35355338, %v603_v15 }
 0x102   : > { %v2201_v45 = vadd.f32 %v2134_v39, %v651_v36  ;;  %v2209_v51 = vadd.f32 %v2134_v39, %v667_v43 }
 0x103   : > { %v1588_v16 = vpop.f32.mrb[10].mxu0  ;;  %v1614_v17 = vpop.f32.mrb[10].mxu1  ;;  %v2204_v48 = vadd.f32 %v2134_v39, %v650_v37  ;;  %v2212_v52 = vadd.f32 %v2134_v39, %v666_v44 }
 0x104   : > { %720 = vmax.xlane.f32.xlu1 %v2169_v12  ;;  %718 = vmax.xlane.f32.xlu0 %v2172_v13  ;;  %v420_v22 = vpop.f32.mrb[11].mxu0  ;;  %v613_v23 = vpop.f32.mrb[11].mxu1  ;;  %v653_v49 = vmul.f32 0.35355338, %v1588_v16  ;;  %v669_v56 = vmul.f32 0.35355338, %v1614_v17 }
 0x105   : > { %v652_v50 = vmul.f32 0.35355338, %v420_v22  ;;  %v668_v57 = vmul.f32 0.35355338, %v613_v23  ;;  %v1979_v22 = vmov 0.0  }
 0x106   : > { %v2219_v58 = vadd.f32 %v2134_v39, %v653_v49  ;;  %v2227_v0 = vadd.f32 %v2134_v39, %v669_v56  ;;  %1653 = vmatprep.mubr.msk.f32.mxu0 %vm1978_vm2, %v1979_v22  ;;  %1688 = vmatprep.mubr.msk.f32.mxu1 %vm1978_vm2, %v1979_v22 }
 0x107   : > { %v1591_v24 = vpop.f32.mrb[12].mxu0  ;;  %v1617_v25 = vpop.f32.mrb[12].mxu1  ;;  %v2222_v59 = vadd.f32 %v2134_v39, %v652_v50  ;;  %v2230_v1 = vadd.f32 %v2134_v39, %v668_v57 }
 0x108   : > { %752 = vmax.xlane.f32.xlu1 %v2177_v20  ;;  %750 = vmax.xlane.f32.xlu0 %v2180_v21  ;;  %v430_v30 = vpop.f32.mrb[13].mxu0  ;;  %v623_v31 = vpop.f32.mrb[13].mxu1  ;;  %v655_v62 = vmul.f32 0.35355338, %v1591_v24  ;;  %v671_v2 = vmul.f32 0.35355338, %v1617_v25 }
 0x109   : > { %v654_v63 = vmul.f32 0.35355338, %v430_v30  ;;  %v670_v3 = vmul.f32 0.35355338, %v623_v31 }
 0x10a   : > { %v2235_v6 = vadd.f32 %v2134_v39, %v655_v62  ;;  %v2243_v10 = vadd.f32 %v2134_v39, %v671_v2 }
 0x10b   : > { %v1594_v32 = vpop.f32.mrb[14].mxu0  ;;  %v1620_v33 = vpop.f32.mrb[14].mxu1  ;;  %v2238_v7 = vadd.f32 %v2134_v39, %v654_v63  ;;  %v2246_v11 = vadd.f32 %v2134_v39, %v670_v3 }
 0x10c   : > { %724 = vmax.xlane.f32.xlu1 %v2185_v28  ;;  %722 = vmax.xlane.f32.xlu0 %v2188_v29  ;;  %v440_v41 = vpop.f32.mrb[15].mxu0  ;;  %v633_v42 = vpop.f32.mrb[15].mxu1  ;;  %v657_v8 = vmul.f32 0.35355338, %v1594_v32  ;;  %v673_v14 = vmul.f32 0.35355338, %v1620_v33 }
 0x10d   : > { %v656_v9 = vmul.f32 0.35355338, %v440_v41  ;;  %v672_v15 = vmul.f32 0.35355338, %v633_v42 }
 0x10e   : > { %v2251_v16 = vadd.f32 %v2134_v39, %v657_v8  ;;  %v2259_v18 = vadd.f32 %v2134_v39, %v673_v14 }
 0x10f   : > { %v2254_v17 = vadd.f32 %v2134_v39, %v656_v9  ;;  %v2262_v19 = vadd.f32 %v2134_v39, %v672_v15 }
 0x110   : > { %756 = vmax.xlane.f32.xlu1 %v2193_v38  ;;  %754 = vmax.xlane.f32.xlu0 %v2196_v40 }
 0x114   : > { %728 = vmax.xlane.f32.xlu1 %v2201_v45  ;;  %726 = vmax.xlane.f32.xlu0 %v2204_v48 }
 0x118   : > { %760 = vmax.xlane.f32.xlu1 %v2209_v51  ;;  %758 = vmax.xlane.f32.xlu0 %v2212_v52 }
 0x11c   : > { %732 = vmax.xlane.f32.xlu1 %v2219_v58  ;;  %730 = vmax.xlane.f32.xlu0 %v2222_v59 }
 0x120   : > { %764 = vmax.xlane.f32.xlu1 %v2227_v0  ;;  %762 = vmax.xlane.f32.xlu0 %v2230_v1 }
 0x124   : > { %736 = vmax.xlane.f32.xlu1 %v2235_v6  ;;  %734 = vmax.xlane.f32.xlu0 %v2238_v7 }
 0x128   : > { %768 = vmax.xlane.f32.xlu1 %v2243_v10  ;;  %766 = vmax.xlane.f32.xlu0 %v2246_v11 }
 0x12c   : > { %740 = vmax.xlane.f32.xlu1 %v2251_v16  ;;  %738 = vmax.xlane.f32.xlu0 %v2254_v17 }
 0x130   : > { %772 = vmax.xlane.f32.xlu1 %v2259_v18  ;;  %770 = vmax.xlane.f32.xlu0 %v2262_v19 }
 0x181   : > { %v745_v23 = vpop.xlane.xlu1 %744  ;;  %v713_v24 = vpop.xlane.xlu0 %712 }
 0x182   : > { %v791_v25 = vsub.f32 %v2137_v46, %v745_v23  ;;  %v775_v26 = vsub.f32 %v2140_v47, %v713_v24 }
 0x184   : > { %v808_v27 = vmul.f32 1.442695, %v775_v26  ;;  %v840_v30 = vmul.f32 1.442695, %v791_v25 }
 0x185   : > { %v743_v31 = vpop.xlane.xlu1 %742  ;;  %v711_v32 = vpop.xlane.xlu0 %710 }
 0x186   : > { %v790_v39 = vsub.f32 %v2145_v54, %v743_v31  ;;  %v774_v33 = vsub.f32 %v2148_v55, %v711_v32  ;;  %1784 = vpow2.f32 %v808_v27 }
 0x187   : > { %1786 = vpow2.f32 %v840_v30 }
 0x188   : > { %v838_v36 = vmul.f32 1.442695, %v790_v39  ;;  %v806_v37 = vmul.f32 1.442695, %v774_v33 }
 0x189   : > { %v717_v41 = vpop.xlane.xlu1 %716  ;;  %v715_v42 = vpop.xlane.xlu0 %714 }
 0x18a   : > { %1788 = vpow2.f32 %v838_v36  ;;  %v777_v43 = vsub.f32 %v2153_v60, %v717_v41  ;;  %v776_v46 = vsub.f32 %v2156_v61, %v715_v42 }
 0x18b   : > { %1790 = vpow2.f32 %v806_v37 }
 0x18c   : > { %v812_v47 = vmul.f32 1.442695, %v777_v43  ;;  %v810_v44 = vmul.f32 1.442695, %v776_v46 }
 0x18d   : > { %v749_v49 = vpop.xlane.xlu1 %748  ;;  %v747_v50 = vpop.xlane.xlu0 %746 }
 0x18e   : > { %v793_v54 = vsub.f32 %v2161_v4, %v749_v49  ;;  %v792_v55 = vsub.f32 %v2164_v5, %v747_v50  ;;  %1792 = vpow2.f32 %v812_v47 }
 0x18f   : > { %1794 = vpow2.f32 %v810_v44 }
 0x190   : > { %v844_v56 = vmul.f32 1.442695, %v793_v54  ;;  %v842_v57 = vmul.f32 1.442695, %v792_v55  ;;  %v1785_v62 = vpop.eup %1784 }
 0x191   : > { %v721_v63 = vpop.xlane.xlu1 %720  ;;  %v719_v2 = vpop.xlane.xlu0 %718  ;;  %872 = vadd.xlane.f32.xlu1 %v1785_v62 }
 0x192   : > { %1796 = vpow2.f32 %v844_v56  ;;  %v779_v60 = vsub.f32 %v2169_v12, %v721_v63  ;;  %v778_v61 = vsub.f32 %v2172_v13, %v719_v2  ;;  %v1787_v3 = vpop.eup %1786 }
 0x193   : > { %1798 = vpow2.f32 %v842_v57 }
 0x194   : > { %v1789_v8 = vpop.eup %1788  ;;  %v816_v9 = vmul.f32 1.442695, %v779_v60  ;;  %v814_v14 = vmul.f32 1.442695, %v778_v61 }
 0x195   : > { %v1791_v4 = vpop.eup %1790  ;;  %v753_v5 = vpop.xlane.xlu1 %752  ;;  %v1716_v22 = vpack.c.bf16 %v1787_v3, %v1789_v8  ;;  %904 = vadd.xlane.f32.xlu1 %v1787_v3 }
 0x196   : > { %v751_v15 = vpop.xlane.xlu0 %750  ;;  %v795_v23 = vsub.f32 %v2177_v20, %v753_v5  ;;  %870 = vadd.xlane.f32.xlu0 %v1791_v4  ;;  %v1692_v25 = vpack.c.bf16 %v1785_v62, %v1791_v4  ;;  %1800 = vpow2.f32 %v816_v9 }
 0x197   : > { %v794_v24 = vsub.f32 %v2180_v21, %v751_v15  ;;  %1717 = vmatpush3.bf16.xpose.msra.mxu1 %v1716_v22  ;;  %1802 = vpow2.f32 %v814_v14 }
 0x198   : > { %v848_v12 = vmul.f32 1.442695, %v795_v23  ;;  %1693 = vmatpush3.bf16.xpose.msra.mxu0 %v1692_v25  ;;  %1718 = vmatprep.subr.bf16.mxu1 %v1977_v53  ;;  %v1793_v30 = vpop.eup %1792 }
 0x199   : > { %v846_v13 = vmul.f32 1.442695, %v794_v24  ;;  %v725_v26 = vpop.xlane.xlu1 %724  ;;  %1694 = vmatprep.subr.bf16.mxu0 %v1977_v53  ;;  %v1795_v31 = vpop.eup %1794 }
 0x19a   : > { %v723_v27 = vpop.xlane.xlu0 %722  ;;  %1804 = vpow2.f32 %v848_v12  ;;  %v781_v20 = vsub.f32 %v2185_v28, %v725_v26  ;;  %902 = vadd.xlane.f32.xlu0 %v1789_v8  ;;  %v1695_v46 = vpack.c.bf16 %v1793_v30, %v1795_v31 }
 0x19b   : > { %v780_v21 = vsub.f32 %v2188_v29, %v723_v27  ;;  %1806 = vpow2.f32 %v846_v13 }
 0x19c   : > { %v1797_v32 = vpop.eup %1796  ;;  %v820_v39 = vmul.f32 1.442695, %v781_v20 }
 0x19d   : > { %v1799_v33 = vpop.eup %1798  ;;  %v818_v36 = vmul.f32 1.442695, %v780_v21  ;;  %v757_v37 = vpop.xlane.xlu1 %756  ;;  %908 = vadd.xlane.f32.xlu1 %v1797_v32 }
 0x19e   : > { %v755_v41 = vpop.xlane.xlu0 %754  ;;  %v797_v42 = vsub.f32 %v2193_v38, %v757_v37  ;;  %876 = vadd.xlane.f32.xlu0 %v1793_v30  ;;  %v1719_v47 = vpack.c.bf16 %v1797_v32, %v1799_v33  ;;  %1808 = vpow2.f32 %v820_v39 }
 0x19f   : > { %v796_v43 = vsub.f32 %v2196_v40, %v755_v41  ;;  %1810 = vpow2.f32 %v818_v36 }
 0x1a0   : > { %v852_v28 = vmul.f32 1.442695, %v797_v42  ;;  %1696 = vmatpush3.bf16.xpose.msra.mxu0 %v1695_v46  ;;  %1720 = vmatpush3.bf16.xpose.msra.mxu1 %v1719_v47  ;;  %v1801_v50 = vpop.eup %1800 }
 0x1a1   : > { %v850_v29 = vmul.f32 1.442695, %v796_v43  ;;  %v729_v44 = vpop.xlane.xlu1 %728  ;;  %906 = vadd.xlane.f32.xlu1 %v1799_v33  ;;  %1697 = vmatprep.subr.bf16.mxu0 %v1977_v53  ;;  %v1803_v54 = vpop.eup %1802 }
 0x1a2   : > { %v727_v49 = vpop.xlane.xlu0 %726  ;;  %1812 = vpow2.f32 %v852_v28  ;;  %v783_v38 = vsub.f32 %v2201_v45, %v729_v44  ;;  %874 = vadd.xlane.f32.xlu0 %v1795_v31  ;;  %1721 = vmatprep.subr.bf16.mxu1 %v1977_v53  ;;  %v1698_v45 = vpack.c.bf16 %v1801_v50, %v1803_v54 }
 0x1a3   : > { %v782_v40 = vsub.f32 %v2204_v48, %v727_v49  ;;  %1814 = vpow2.f32 %v850_v29 }
 0x1a4   : > { %v1805_v55 = vpop.eup %1804  ;;  %v824_v56 = vmul.f32 1.442695, %v783_v38 }
 0x1a5   : > { %v1807_v57 = vpop.eup %1806  ;;  %v822_v62 = vmul.f32 1.442695, %v782_v40  ;;  %v761_v63 = vpop.xlane.xlu1 %760  ;;  %912 = vadd.xlane.f32.xlu1 %v1805_v55 }
 0x1a6   : > { %v759_v2 = vpop.xlane.xlu0 %758  ;;  %v799_v60 = vsub.f32 %v2209_v51, %v761_v63  ;;  %880 = vadd.xlane.f32.xlu0 %v1801_v50  ;;  %v1722_v3 = vpack.c.bf16 %v1805_v55, %v1807_v57  ;;  %1816 = vpow2.f32 %v824_v56 }
 0x1a7   : > { %v798_v61 = vsub.f32 %v2212_v52, %v759_v2  ;;  %1818 = vpow2.f32 %v822_v62 }
 0x1a8   : > { %v856_v48 = vmul.f32 1.442695, %v799_v60  ;;  %1699 = vmatpush3.bf16.xpose.msra.mxu0 %v1698_v45  ;;  %1723 = vmatpush3.bf16.xpose.msra.mxu1 %v1722_v3  ;;  %v1809_v14 = vpop.eup %1808 }
 0x1a9   : > { %v854_v8 = vmul.f32 1.442695, %v798_v61  ;;  %v733_v9 = vpop.xlane.xlu1 %732  ;;  %910 = vadd.xlane.f32.xlu1 %v1807_v57  ;;  %1700 = vmatprep.subr.bf16.mxu0 %v1977_v53  ;;  %v1811_v5 = vpop.eup %1810 }
 0x1aa   : > { %v731_v4 = vpop.xlane.xlu0 %730  ;;  %1820 = vpow2.f32 %v856_v48  ;;  %v785_v51 = vsub.f32 %v2219_v58, %v733_v9  ;;  %878 = vadd.xlane.f32.xlu0 %v1803_v54  ;;  %1724 = vmatprep.subr.bf16.mxu1 %v1977_v53  ;;  %v1701_v58 = vpack.c.bf16 %v1809_v14, %v1811_v5 }
 0x1ab   : > { %v784_v52 = vsub.f32 %v2222_v59, %v731_v4  ;;  %1822 = vpow2.f32 %v854_v8 }
 0x1ac   : > { %v1813_v15 = vpop.eup %1812  ;;  %v828_v22 = vmul.f32 1.442695, %v785_v51 }
 0x1ad   : > { %v1815_v23 = vpop.eup %1814  ;;  %v826_v24 = vmul.f32 1.442695, %v784_v52  ;;  %v765_v25 = vpop.xlane.xlu1 %764  ;;  %916 = vadd.xlane.f32.xlu1 %v1813_v15 }
 0x1ae   : > { %v763_v12 = vpop.xlane.xlu0 %762  ;;  %v801_v13 = vsub.f32 %v2227_v0, %v765_v25  ;;  %884 = vadd.xlane.f32.xlu0 %v1809_v14  ;;  %v1725_v27 = vpack.c.bf16 %v1813_v15, %v1815_v23  ;;  %1824 = vpow2.f32 %v828_v22  ;;  %v254_v15 = vld [vmem:[%s216_s8 + $0x8] sm:$0xff] }
 0x1af   : > { %v800_v26 = vsub.f32 %v2230_v1, %v763_v12  ;;  %1826 = vpow2.f32 %v826_v24 }
 0x1b0   : > { %v860_v59 = vmul.f32 1.442695, %v801_v13  ;;  %1702 = vmatpush3.bf16.xpose.msra.mxu0 %v1701_v58  ;;  %1726 = vmatpush3.bf16.xpose.msra.mxu1 %v1725_v27  ;;  %v1817_v31 = vpop.eup %1816 }
 0x1b1   : > { %v858_v30 = vmul.f32 1.442695, %v800_v26  ;;  %v737_v20 = vpop.xlane.xlu1 %736  ;;  %914 = vadd.xlane.f32.xlu1 %v1815_v23  ;;  %1703 = vmatprep.subr.bf16.mxu0 %v1977_v53  ;;  %v1819_v32 = vpop.eup %1818 }
 0x1b2   : > { %v735_v21 = vpop.xlane.xlu0 %734  ;;  %1828 = vpow2.f32 %v860_v59  ;;  %v787_v0 = vsub.f32 %v2235_v6, %v737_v20  ;;  %882 = vadd.xlane.f32.xlu0 %v1811_v5  ;;  %1727 = vmatprep.subr.bf16.mxu1 %v1977_v53  ;;  %v1704_v6 = vpack.c.bf16 %v1817_v31, %v1819_v32  ;;  %v253_v5 = vld [vmem:[%s216_s8] sm:$0xff] }
 0x1b3   : > { %v786_v1 = vsub.f32 %v2238_v7, %v735_v21  ;;  %1830 = vpow2.f32 %v858_v30 }
 0x1b4   : > { %v1821_v39 = vpop.eup %1820  ;;  %v832_v33 = vmul.f32 1.442695, %v787_v0 }
 0x1b5   : > { %v1823_v36 = vpop.eup %1822  ;;  %v830_v37 = vmul.f32 1.442695, %v786_v1  ;;  %v769_v41 = vpop.xlane.xlu1 %768  ;;  %920 = vadd.xlane.f32.xlu1 %v1821_v39 }
 0x1b6   : > { %v767_v42 = vpop.xlane.xlu0 %766  ;;  %v803_v43 = vsub.f32 %v2243_v10, %v769_v41  ;;  %888 = vadd.xlane.f32.xlu0 %v1817_v31  ;;  %v1728_v47 = vpack.c.bf16 %v1821_v39, %v1823_v36  ;;  %1832 = vpow2.f32 %v832_v33 }
 0x1b7   : > { %v802_v46 = vsub.f32 %v2246_v11, %v767_v42  ;;  %1834 = vpow2.f32 %v830_v37 }
 0x1b8   : > { %v864_v7 = vmul.f32 1.442695, %v803_v43  ;;  %1705 = vmatpush3.bf16.xpose.msra.mxu0 %v1704_v6  ;;  %1729 = vmatpush3.bf16.xpose.msra.mxu1 %v1728_v47  ;;  %v1825_v49 = vpop.eup %1824  ;;  %v1149_v6 = vadd.s32 4294967280, %v2131_v35 }
 0x1b9   : > { %v862_v28 = vmul.f32 1.442695, %v802_v46  ;;  %918 = vadd.xlane.f32.xlu1 %v1823_v36  ;;  %v741_v29 = vpop.xlane.xlu1 %740  ;;  %1706 = vmatprep.subr.bf16.mxu0 %v1977_v53  ;;  %v1827_v50 = vpop.eup %1826 }
 0x1ba   : > { %v739_v44 = vpop.xlane.xlu0 %738  ;;  %1836 = vpow2.f32 %v864_v7  ;;  %v789_v10 = vsub.f32 %v2251_v16, %v741_v29  ;;  %886 = vadd.xlane.f32.xlu0 %v1819_v32  ;;  %1730 = vmatprep.subr.bf16.mxu1 %v1977_v53  ;;  %v1707_v16 = vpack.c.bf16 %v1825_v49, %v1827_v50  ;;  %v1142_v29 = vadd.s32 4294967288, %v2131_v35 }
 0x1bb   : > { %v788_v11 = vsub.f32 %v2254_v17, %v739_v44  ;;  %1838 = vpow2.f32 %v862_v28  ;;  %v2329_v28 = vshrl.u32 %v674_v34, 7  ;;  %v1163_v34 = vadd.s32 4294967264, %v2131_v35 }
 0x1bc   : > { %v1829_v38 = vpop.eup %1828  ;;  %v836_v40 = vmul.f32 1.442695, %v789_v10 }
 0x1bd   : > { %v1831_v54 = vpop.eup %1830  ;;  %v834_v55 = vmul.f32 1.442695, %v788_v11  ;;  %924 = vadd.xlane.f32.xlu1 %v1829_v38  ;;  %v773_v56 = vpop.xlane.xlu1 %772  ;;  %v1170_v11 = vadd.s32 4294967256, %v2131_v35 }
 0x1be   : > { %v771_v57 = vpop.xlane.xlu0 %770  ;;  %v805_v62 = vsub.f32 %v2259_v18, %v773_v56  ;;  %892 = vadd.xlane.f32.xlu0 %v1825_v49  ;;  %v1731_v2 = vpack.c.bf16 %v1829_v38, %v1831_v54  ;;  %1840 = vpow2.f32 %v836_v40  ;;  %v1156_v49 = vadd.s32 4294967272, %v2131_v35 }
 0x1bf   : > { %v804_v63 = vsub.f32 %v2262_v19, %v771_v57  ;;  %1842 = vpow2.f32 %v834_v55  ;;  %v1140_v38 = vsub.s32 %v2131_v35, %v2329_v28  ;;  %v1152_v40 = vsub.s32 %v1149_v6, %v2329_v28 }
 0x1c0   : > { %v868_v17 = vmul.f32 1.442695, %v805_v62  ;;  %1708 = vmatpush3.bf16.xpose.msra.mxu0 %v1707_v16  ;;  %1732 = vmatpush3.bf16.xpose.msra.mxu1 %v1731_v2  ;;  %v1833_v61 = vpop.eup %1832  ;;  %v1145_v55 = vsub.s32 %v1142_v29, %v2329_v28  ;;  %v1159_v62 = vsub.s32 %v1156_v49, %v2329_v28  ;;  %v1198_v29 = vadd.s32 4294967224, %v2131_v35 }
 0x1c1   : > { %v866_v60 = vmul.f32 1.442695, %v804_v63  ;;  %922 = vadd.xlane.f32.xlu1 %v1831_v54  ;;  %1709 = vmatprep.subr.bf16.mxu0 %v1977_v53  ;;  %v1835_v18 = vpop.eup %1834  ;;  %v1184_v63 = vadd.s32 4294967240, %v2131_v35 }
 0x1c2   : > { %1844 = vpow2.f32 %v868_v17  ;;  %890 = vadd.xlane.f32.xlu0 %v1827_v50  ;;  %1733 = vmatprep.subr.bf16.mxu1 %v1977_v53  ;;  %v1710_v3 = vpack.c.bf16 %v1833_v61, %v1835_v18 }
 0x1c3   : > { %1846 = vpow2.f32 %v866_v60  ;;  %v2342_v60 = vsub.s32 %v1170_v11, %v2329_v28  ;;  %v1212_v11 = vadd.s32 4294967208, %v2131_v35 }
 0x1c4   : > { %v1837_v45 = vpop.eup %1836 }
 0x1c5   : > { %v1839_v19 = vpop.eup %1838  ;;  %928 = vadd.xlane.f32.xlu1 %v1837_v45 }
 0x1c6   : > { %896 = vadd.xlane.f32.xlu0 %v1833_v61  ;;  %v1734_v48 = vpack.c.bf16 %v1837_v45, %v1839_v19  ;;  %v1177_v61 = vadd.s32 4294967248, %v2131_v35 }
 0x1c8   : > { %1711 = vmatpush3.bf16.xpose.msra.mxu0 %v1710_v3  ;;  %1735 = vmatpush3.bf16.xpose.msra.mxu1 %v1734_v48  ;;  %v1841_v8 = vpop.eup %1840  ;;  %v1166_v3 = vsub.s32 %v1163_v34, %v2329_v28  ;;  %v1219_v34 = vadd.s32 4294967200, %v2131_v35 }
 0x1c9   : > { %926 = vadd.xlane.f32.xlu1 %v1839_v19  ;;  %1712 = vmatprep.subr.bf16.mxu0 %v1977_v53  ;;  %v1843_v9 = vpop.eup %1842 }
 0x1ca   : > { %894 = vadd.xlane.f32.xlu0 %v1835_v18  ;;  %1736 = vmatprep.subr.bf16.mxu1 %v1977_v53  ;;  %v1713_v51 = vpack.c.bf16 %v1841_v8, %v1843_v9 }
 0x1cc   : > { %v1845_v4 = vpop.eup %1844 }
 0x1cd   : > { %v1847_v14 = vpop.eup %1846 }
 0x1ce   : > { %898 = vadd.xlane.f32.xlu0 %v1843_v9  ;;  %930 = vadd.xlane.f32.xlu1 %v1847_v14  ;;  %v1737_v52 = vpack.c.bf16 %v1845_v4, %v1847_v14 }
 0x1d0   : > { %1714 = vmatpush3.bf16.xpose.msra.mxu0 %v1713_v51  ;;  %1738 = vmatpush3.bf16.xpose.msra.mxu1 %v1737_v52  ;;  %v2347_v51 = vsub.s32 %v1184_v63, %v2329_v28 }
 0x1d2   : > { %900 = vadd.xlane.f32.xlu0 %v1841_v8  ;;  %932 = vadd.xlane.f32.xlu1 %v1845_v4 }
 0x1d7   : > { %1654 = vmatmul.mubr.f32.vlgmr.msra.gmra.mrb[16].mxu0 %v253_v5  ;;  %1689 = vmatmul.mubr.f32.vlgmr.msra.gmra.mrb[16].mxu1 %v254_v15  ;;  %v1180_v15 = vsub.s32 %v1177_v61, %v2329_v28  ;;  %v1226_v61 = vadd.s32 4294967192, %v2131_v35 }
 0x21e   : > { %v873_v22 = vpop.xlane.xlu1 %872 }
 0x21f   : > { %1848 = vrcp.f32 %v873_v22 }
 0x222   : > { %v905_v24 = vpop.xlane.xlu1 %904 }
 0x223   : > { %v871_v53 = vpop.xlane.xlu0 %870  ;;  %1850 = vrcp.f32 %v905_v24 }
 0x224   : > { %1852 = vrcp.f32 %v871_v53  ;;  %v1191_v53 = vadd.s32 4294967232, %v2131_v35 }
 0x227   : > { %v903_v23 = vpop.xlane.xlu0 %902 }
 0x228   : > { %1854 = vrcp.f32 %v903_v23 }
 0x229   : > { %v1849_v46 = vpop.eup %1848 }
 0x22a   : > { %v909_v25 = vpop.xlane.xlu1 %908  ;;  %v1146_v14 = vrot.slane %v1849_v46, %v1145_v55 }
 0x22b   : > { %v877_v12 = vpop.xlane.xlu0 %876  ;;  %1856 = vrcp.f32 %v909_v25 }
 0x22d   : > { %v1851_v7 = vpop.eup %1850 }
 0x22e   : > { %v907_v13 = vpop.xlane.xlu1 %906  ;;  %v1853_v44 = vpop.eup %1852  ;;  %v1254_v8 = vrot.slane %v1851_v7, %v1145_v55 }
 0x22f   : > { %v875_v26 = vpop.xlane.xlu0 %874  ;;  %1858 = vrcp.f32 %v907_v13  ;;  %v1141_v45 = vrot.slane %v1853_v44, %v1140_v38 }
 0x230   : > { %1860 = vrcp.f32 %v875_v26 }
 0x231   : > { %1862 = vrcp.f32 %v877_v12  ;;  %v1148_v24 = vsel %vm1147_vm3, %v1146_v14, %v1141_v45 }
 0x232   : > { %v913_v58 = vpop.xlane.xlu1 %912  ;;  %v1855_v10 = vpop.eup %1854 }
 0x233   : > { %v881_v27 = vpop.xlane.xlu0 %880  ;;  %1864 = vrcp.f32 %v913_v58  ;;  %v1250_v17 = vrot.slane %v1855_v10, %v1140_v38 }
 0x235   : > { %v1857_v50 = vpop.eup %1856  ;;  %v1255_v5 = vsel %vm1147_vm3, %v1254_v8, %v1250_v17 }
 0x236   : > { %v911_v59 = vpop.xlane.xlu1 %910  ;;  %v1264_v58 = vrot.slane %v1857_v50, %v1159_v62 }
 0x237   : > { %v879_v30 = vpop.xlane.xlu0 %878  ;;  %1866 = vrcp.f32 %v911_v59 }
 0x238   : > { %1868 = vrcp.f32 %v879_v30 }
 0x239   : > { %1870 = vrcp.f32 %v881_v27  ;;  %v1859_v54 = vpop.eup %1858 }
 0x23a   : > { %v917_v20 = vpop.xlane.xlu1 %916  ;;  %v1861_v57 = vpop.eup %1860  ;;  %v1259_v19 = vrot.slane %v1859_v54, %v1152_v40 }
 0x23b   : > { %v885_v21 = vpop.xlane.xlu0 %884  ;;  %1872 = vrcp.f32 %v917_v20  ;;  %v1863_v2 = vpop.eup %1862  ;;  %v1153_v9 = vrot.slane %v1861_v57, %v1152_v40 }
 0x23c   : > { %v1260_v25 = vsel %vm1154_vm4, %v1259_v19, %v1255_v5  ;;  %v1160_v20 = vrot.slane %v1863_v2, %v1159_v62  ;;  %v1201_v2 = vsub.s32 %v1198_v29, %v2329_v28 }
 0x23d   : > { %v1865_v18 = vpop.eup %1864  ;;  %v1155_v27 = vsel %vm1154_vm4, %v1153_v9, %v1148_v24 }
 0x23e   : > { %v915_v31 = vpop.xlane.xlu1 %914 }
 0x23f   : > { %v883_v0 = vpop.xlane.xlu0 %882  ;;  %1874 = vrcp.f32 %v915_v31  ;;  %v1265_v31 = vsel %vm1161_vm5, %v1264_v58, %v1260_v25  ;;  %v1229_v25 = vsub.s32 %v1226_v61, %v2329_v28 }
 0x240   : > { %1876 = vrcp.f32 %v883_v0  ;;  %v1194_v0 = vsub.s32 %v1191_v53, %v2329_v28  ;;  %v1240_v53 = vadd.s32 4294967176, %v2131_v35 }
 0x241   : > { %1878 = vrcp.f32 %v885_v21  ;;  %v1867_v48 = vpop.eup %1866 }
 0x242   : > { %v921_v1 = vpop.xlane.xlu1 %920  ;;  %v1869_v4 = vpop.eup %1868  ;;  %v1269_v12 = vrot.slane %v1867_v48, %v1166_v3  ;;  %v1233_v48 = vadd.s32 4294967184, %v2131_v35 }
 0x243   : > { %v889_v32 = vpop.xlane.xlu0 %888  ;;  %1880 = vrcp.f32 %v921_v1  ;;  %v1871_v52 = vpop.eup %1870  ;;  %v1167_v59 = vrot.slane %v1869_v4, %v1166_v3  ;;  %v1205_v1 = vadd.s32 4294967216, %v2131_v35  ;;  %v1222_v3 = vsub.s32 %v1219_v34, %v2329_v28 }
 0x244   : > { %v1174_v7 = vrot.slane %v1871_v52, %v2342_v60 }
 0x245   : > { %v2353_v23 = vpop.eup %1872  ;;  %v1208_v50 = vsub.s32 %v1205_v1, %v2329_v28 }
 0x246   : > { %v919_v39 = vpop.xlane.xlu1 %918  ;;  %v1284_v63 = vrot.slane %v2353_v23, %v2347_v51 }
 0x247   : > { %v887_v33 = vpop.xlane.xlu0 %886  ;;  %1882 = vrcp.f32 %v919_v39  ;;  %v1270_v39 = vsel %vm1168_vm6, %v1269_v12, %v1265_v31  ;;  %v1236_v12 = vsub.s32 %v1233_v48, %v2329_v28  ;;  %v1243_v31 = vsub.s32 %v1240_v53, %v2329_v28 }
 0x248   : > { %1884 = vrcp.f32 %v887_v33  ;;  %v1162_v33 = vsel %vm1161_vm5, %v1160_v20, %v1155_v27 }
 0x249   : > { %1886 = vrcp.f32 %v889_v32  ;;  %v1875_v26 = vpop.eup %1874 }
 0x24a   : > { %v2317_v36 = vpop.xlane.xlu1 %924  ;;  %v1877_v30 = vpop.eup %1876 }
 0x24b   : > { %v2319_v37 = vpop.xlane.xlu0 %892  ;;  %1888 = vrcp.f32 %v2317_v36  ;;  %v1879_v21 = vpop.eup %1878  ;;  %v1279_v36 = vrot.slane %v1875_v26, %v1180_v15 }
 0x24d   : > { %v2364_v32 = vpop.eup %1880 }
 0x24e   : > { %v923_v41 = vpop.xlane.xlu1 %922  ;;  %v1294_v5 = vrot.slane %v2364_v32, %v1201_v2 }
 0x24f   : > { %v2321_v42 = vpop.xlane.xlu0 %890  ;;  %1890 = vrcp.f32 %v923_v41  ;;  %v1274_v41 = vrot.slane %v1865_v18, %v2342_v60  ;;  %v1215_v60 = vsub.s32 %v1212_v11, %v2329_v28 }
 0x250   : > { %1892 = vrcp.f32 %v2321_v42  ;;  %v1169_v42 = vsel %vm1168_vm6, %v1167_v59, %v1162_v33 }
 0x251   : > { %1894 = vrcp.f32 %v2319_v37  ;;  %v1883_v37 = vpop.eup %1882  ;;  %v1275_v10 = vsel %vm1175_vm7, %v1274_v41, %v1270_v39  ;;  %v1176_v40 = vsel %vm1175_vm7, %v1174_v7, %v1169_v42 }
 0x252   : > { %v2323_v43 = vpop.xlane.xlu1 %928  ;;  %v1885_v6 = vpop.eup %1884 }
 0x253   : > { %v2326_v47 = vpop.xlane.xlu0 %896  ;;  %1896 = vrcp.f32 %v2323_v43  ;;  %v1181_v43 = vrot.slane %v1877_v30, %v1180_v15  ;;  %v1887_v49 = vpop.eup %1886  ;;  %v1195_v57 = vrot.slane %v1885_v6, %v1194_v0 }
 0x254   : > { %v1202_v15 = vrot.slane %v1887_v49, %v1201_v2 }
 0x255   : > { %v1889_v38 = vpop.eup %1888  ;;  %v1183_v55 = vsel %vm1182_vm8, %v1181_v43, %v1176_v40 }
 0x256   : > { %v927_v56 = vpop.xlane.xlu1 %926  ;;  %v1304_v35 = vrot.slane %v1889_v38, %v1215_v60 }
 0x257   : > { %v895_v16 = vpop.xlane.xlu0 %894  ;;  %1898 = vrcp.f32 %v927_v56  ;;  %v1289_v56 = vrot.slane %v1883_v37, %v1194_v0 }
 0x258   : > { %1900 = vrcp.f32 %v895_v16  ;;  %v1188_v16 = vrot.slane %v1879_v21, %v2347_v51 }
 0x259   : > { %1902 = vrcp.f32 %v2326_v47  ;;  %v1280_v47 = vsel %vm1182_vm8, %v1279_v36, %v1275_v10  ;;  %v1891_v54 = vpop.eup %1890 }
 0x25a   : > { %v1893_v62 = vpop.eup %1892  ;;  %v1285_v45 = vsel %vm1189_vm9, %v1284_v63, %v1280_v47  ;;  %v1190_v19 = vsel %vm1189_vm9, %v1188_v16, %v1183_v55  ;;  %v1299_v14 = vrot.slane %v1891_v54, %v1208_v50 }
 0x25b   : > { %v931_v22 = vpop.xlane.xlu1 %930  ;;  %v899_v13 = vpop.xlane.xlu0 %898  ;;  %v1290_v9 = vsel %vm1196_vm10, %v1289_v56, %v1285_v45  ;;  %v1197_v4 = vsel %vm1196_vm10, %v1195_v57, %v1190_v19  ;;  %v1209_v51 = vrot.slane %v1893_v62, %v1208_v50 }
 0x25c   : > { %1904 = vrcp.f32 %v931_v22  ;;  %v1895_v17 = vpop.eup %1894  ;;  %v1204_v24 = vsel %vm1203_vm11, %v1202_v15, %v1197_v4 }
 0x25d   : > { %1906 = vrcp.f32 %v899_v13  ;;  %v1897_v18 = vpop.eup %1896  ;;  %v1295_v13 = vsel %vm1203_vm11, %v1294_v5, %v1290_v9  ;;  %v1211_v59 = vsel %vm1210_vm12, %v1209_v51, %v1204_v24  ;;  %v1216_v21 = vrot.slane %v1895_v17, %v1215_v60 }
 0x25e   : > { %v1300_v30 = vsel %vm1210_vm12, %v1299_v14, %v1295_v13  ;;  %v1314_v43 = vrot.slane %v1897_v18, %v1229_v25 }
 0x25f   : > { %v933_v46 = vpop.xlane.xlu1 %932  ;;  %v901_v44 = vpop.xlane.xlu0 %900  ;;  %v1218_v1 = vsel %vm1217_vm13, %v1216_v21, %v1211_v59  ;;  %v1305_v32 = vsel %vm1217_vm13, %v1304_v35, %v1300_v30 }
 0x260   : > { %1908 = vrcp.f32 %v933_v46 }
 0x261   : > { %1910 = vrcp.f32 %v901_v44  ;;  %v1899_v8 = vpop.eup %1898 }
 0x262   : > { %v1901_v52 = vpop.eup %1900  ;;  %v1309_v58 = vrot.slane %v1899_v8, %v1222_v3 }
 0x263   : > { %v1903_v22 = vpop.eup %1902  ;;  %v1223_v27 = vrot.slane %v1901_v52, %v1222_v3 }
 0x264   : > { %v1310_v36 = vsel %vm1224_vm14, %v1309_v58, %v1305_v32  ;;  %v1230_v41 = vrot.slane %v1903_v22, %v1229_v25 }
 0x265   : > { %v1225_v39 = vsel %vm1224_vm14, %v1223_v27, %v1218_v1  ;;  %v1315_v6 = vsel %vm1231_vm15, %v1314_v43, %v1310_v36 }
 0x266   : > { %v1905_v23 = vpop.eup %1904  ;;  %v1232_v28 = vsel %vm1231_vm15, %v1230_v41, %v1225_v39 }
 0x267   : > { %v1907_v26 = vpop.eup %1906  ;;  %v1319_v37 = vrot.slane %v1905_v23, %v1236_v12 }
 0x268   : > { %v1237_v33 = vrot.slane %v1907_v26, %v1236_v12 }
 0x269   : > { %v1320_v29 = vsel %vm1238_vm0, %v1319_v37, %v1315_v6 }
 0x26a   : > { %v1909_v20 = vpop.eup %1908  ;;  %v1239_v7 = vsel %vm1238_vm0, %v1237_v33, %v1232_v28 }
 0x26b   : > { %v1911_v0 = vpop.eup %1910  ;;  %v1324_v46 = vrot.slane %v1909_v20, %v1243_v31 }
 0x26c   : > { %v1244_v42 = vrot.slane %v1911_v0, %v1243_v31 }
 0x26d   : > { %v1325_v11 = vsel %vm1245_vm1, %v1324_v46, %v1320_v29 }
 0x26e   : > { %v1246_v49 = vsel %vm1245_vm1, %v1244_v42, %v1239_v7 }
 0x2aa   : > { %v1000_v44 = vpop.f32.mrb[16].mxu0  ;;  %v1070_v10 = vpop.f32.mrb[16].mxu1 }
 0x2ab   : > { %v1346_v50 = vmul.f32 %v1246_v49, %v1000_v44  ;;  %v1347_v38 = vmul.f32 %v1325_v11, %v1070_v10  ;;  %v1655_v47 = vpop.f32.mrb[17].mxu0  ;;  %v1690_v40 = vpop.f32.mrb[17].mxu1 }
 0x2ad   : > { %1348 = vst [vmem:[%s198_s11] sm:$0xff] %v1346_v50  ;;  %1349 = vst [vmem:[%s198_s11 + $0x8] sm:$0xff] %v1347_v38 }
 0x2ae   : > { %1925 = shalt.err (!%p1922_p3)
}
 0x2af   : > { %s1926_s30 = scalar_lea.hbm %s2412_s24, 256  ;;  %s1930_s6 = scalar_lea.hbm %s2460_s3, 512 }
 0x2b0   : > { %p1927_p4 = scmp.ne.s32.totalorder %s2412_s24, %s1926_s30  ;;  %p1931_p9 = scmp.lt.u32.totalorder %s2412_s24, %s2460_s3 }
 0x2b1   : > { %p1932_p10 = scmp.lt.u32.totalorder %s1930_s6, %s1926_s30  ;;  %p1934_p12 = scmp.lt.u32.totalorder %s1926_s30, %s2412_s24 }
 0x2b2   : > { %p1928_p7 = pnand %p1927_p4, %p2041_p5 }
 0x2b3   : > { %p1933_p11 = por %p1932_p10, %p1931_p9 }
 0x2b4   : > { %p1929_p8 = pneg %p1928_p7 }
 0x2b5   : > { %p1935_p13 = por %p1934_p12, %p1933_p11 }
 0x2b7   : > { %p1936_p0 = pnand %p1935_p13, %p1929_p8 }
 0x2b9   : > { %1939 = shalt.err (!%p1936_p0)
}
 0x2ba   : > { %s1981_s9 = smov 128   ;;  %s1982_s10 = smov 8  }
 0x2bb   : > { %1739 = dma.vmem_to_hbm [thread:$0]  (%p2041_p5), %s2407_s17, 256, %s2412_s24, %s2416_s25, %s1981_s9, %s1981_s9, %s1982_s10  }
 0x2bc PF: > { %p1745_p1 = scmp.ge.s32.totalorder %s1974_s15, 2  ;;  %s1379_s11 = sand.u32 1, %s1962_s12  }
 0x2bd   : > { %s1380_s19 = scalar_lea.sflag [#allocation3], %s1379_s11 }
 0x2be   : > { %p1742_p2 = pnand %p1745_p1, %p2045_p6 }
 0x2c0   : > { %1957 = dma.done.wait (!%p1742_p2), %s1380_s19, 256  }
 0x2c1   : > { %1959 = vsyncadd (!%p1742_p2), %s1380_s19, 4294967040  ;;  %p13_p3 = scmp.ge.s32.totalorder %s2028_s18, 4   ;;  %s2463_s12 = smov %s1966_s13 }
 0x2c2   : > { %s2464_s13 = smov %s1970_s14  ;;  %s2465_s14 = smov %s2039_s21 }
 0x2c3   : > { %s2466_s15 = smov %s2028_s18  ;;  %15 = sbr.rel (!%p13_p3) target bundleno = 3 (0x3), region = 73 }
 0x2ca   :  { %1385 = vsyncpa [#allocation3], 1 }
 0x2cb   :  { %1387 = vsyncpa [#allocation3 + $0x1], 1 }

</bundles_post_ra>
